<compile_context>
chip_gen: v5e
topology: v5e:2x2
jax: 0.10.0
libtpu: 0.0.40
codegen_flags: <defaults>
</compile_context>

<pallas_src>
import jax
import jax.numpy as jnp
from jax.experimental import pallas as pl
from jax.experimental.pallas import tpu as pltpu


# ----------------------------- helpers --------------------------------------

def _round_up(a, b):
    return ((a + b - 1) // b) * b


def _cdiv(a, b):
    return (a + b - 1) // b


def _sublane_pack(dtype):
    # Sub-32-bit dtypes pack along sublanes: f32 -> 8, bf16 -> 16, int8/fp8 -> 32.
    return 32 // jnp.dtype(dtype).itemsize


def _default_target_block_bytes():
    """Per-generation budget for one *input* activation block (bytes)."""
    try:
        kind = jax.devices()[0].device_kind.lower()
    except Exception:
        kind = ""
    if "v7" in kind:
        return 6 * 1024 * 1024   # 3.2 TB/s HBM: larger tiles hide per-step overhead
    if "v6" in kind:
        return 4 * 1024 * 1024
    # v5e (16 MiB scoped-VMEM default) and unknown: conservative; 1-2 MiB tiles
    # already sit on the ~85% HBM-roofline plateau.
    return 2 * 1024 * 1024


def _vmem_limit(block_bytes):
    # in + out, double-buffered, plus slack for the tiny weight & internal scratch.
    need = 4 * block_bytes + 4 * 1024 * 1024
    return int(min(max(need, 16 * 1024 * 1024), 48 * 1024 * 1024))


# ----------------------------- kernels --------------------------------------

def _sse_kernel_leading_c(x_ref, w_ref, o_ref):
    """Small-C path: channels on a leading (untiled) axis, spatial fills vregs.

    x_ref/o_ref: [1, C, S_t, 128] activation tile (fully packed vregs).
    w_ref:       SMEM [C] f32 1x1-conv weight.
    """
    x = x_ref[...]
    C = x.shape[1]
    # 1x1 conv == weighted channel sum. f32 multiplicands + f32 accumulation,
    # expressed as C full-vreg VALU multiply-adds (no XLU, no sublane padding).
    s = x[:, 0].astype(jnp.float32) * w_ref[0]
    for c in range(1, C):
        s = s + x[:, c].astype(jnp.float32) * w_ref[c]
    att = jax.nn.sigmoid(s)                          # EUP exp; [1, S_t, 128]
    att = att.astype(x.dtype)
    # Broadcast over the leading C axis: full-vreg reuse, no lane/sublane bcast.
    o_ref[...] = x * att[:, None]


def _sse_kernel_sublane_c(x_ref, w_ref, o_ref):
    """Fallback path: channels on the sublane axis (C >= pack factor or HW%128!=0).

    x_ref/o_ref: [1, C, HWt]; w_ref: VMEM [1, C, 1] f32.
    """
    x = x_ref[...]
    prod = x.astype(jnp.float32) * w_ref[...]        # true-f32 products
    s = jnp.sum(prod, axis=1, keepdims=True)         # sublane reduction, f32 acc
    att = jax.nn.sigmoid(s).astype(x.dtype)          # [1, 1, HWt]
    o_ref[...] = x * att


# ----------------------------- wrapper --------------------------------------

def se_block(x_nchw, w, *, target_block_bytes=None):
    """Spatial-SE block. x_nchw: [N, C, H, W]; w: any shape with C elements."""
    N, C, H, W = x_nchw.shape
    HW = H * W
    dtype = x_nchw.dtype
    itemsize = jnp.dtype(dtype).itemsize
    pack = _sublane_pack(dtype)
    if target_block_bytes is None:
        target_block_bytes = _default_target_block_bytes()

    w_flat = w.reshape(C).astype(jnp.float32)
    lane_w = 128

    use_leading_c = (C < pack) and (HW % lane_w == 0)

    if use_leading_c:
        # ---- small-C path: [N, C, HW] -> [N, C, R, 128] (free view) ----------
        R = HW // lane_w
        x4 = x_nchw.reshape(N, C, R, lane_w)
        row_bytes = C * lane_w * itemsize
        s_t = max(8, (target_block_bytes // max(1, row_bytes)) // 8 * 8)
        if s_t >= R:
            s_t = R
        else:
            n_s = _cdiv(R, s_t)
            s_t = min(R, _round_up(_cdiv(R, n_s), 8))          # balanced tail
        # Guarantee >=2 blocks so megacore (v7x) has work to shard.
        if N * _cdiv(R, s_t) == 1 and R >= 16:
            s_t = _round_up(_cdiv(R, 2), 8)
        n_s = _cdiv(R, s_t)
        block_bytes = C * s_t * lane_w * itemsize               # no padding waste

        out = pl.pallas_call(
            _sse_kernel_leading_c,
            out_shape=jax.ShapeDtypeStruct((N, C, R, lane_w), dtype),
            grid_spec=pltpu.PrefetchScalarGridSpec(
                num_scalar_prefetch=0,
                grid=(N, n_s),
                in_specs=[
                    pl.BlockSpec((1, C, s_t, lane_w), lambda n, t: (n, 0, t, 0)),
                    pl.BlockSpec(memory_space=pltpu.MemorySpace.SMEM),  # weights
                ],
                out_specs=pl.BlockSpec((1, C, s_t, lane_w),
                                       lambda n, t: (n, 0, t, 0)),
            ),
            compiler_params=pltpu.CompilerParams(
                dimension_semantics=("parallel", "parallel"),
                vmem_limit_bytes=_vmem_limit(block_bytes)),
        )(x4, w_flat)
        return out.reshape(N, C, H, W)

    # ---- fallback path: channels on sublanes, spatial on lanes ---------------
    x3 = x_nchw.reshape(N, C, HW)
    w3 = w_flat.reshape(1, C, 1)
    C_pad = _round_up(C, pack)                      # physical sublane padding
    cols = target_block_bytes // max(1, C_pad * itemsize)
    cols = max(lane_w, (cols // lane_w) * lane_w)
    if cols >= HW:
        hwt = HW
    else:
        n_hw = _cdiv(HW, cols)
        hwt = min(HW, _round_up(_cdiv(HW, n_hw), lane_w))       # balanced tail
    # Guarantee >=2 blocks so megacore (v7x) has work to shard.
    if N * _cdiv(HW, hwt) == 1 and HW >= 2 * lane_w:
        hwt = _round_up(_cdiv(HW, 2), lane_w)
    n_hw = _cdiv(HW, hwt)
    block_bytes = C_pad * hwt * itemsize            # padded footprint, per review

    out = pl.pallas_call(
        _sse_kernel_sublane_c,
        out_shape=jax.ShapeDtypeStruct((N, C, HW), dtype),
        grid_spec=pltpu.PrefetchScalarGridSpec(
            num_scalar_prefetch=0,
            grid=(N, n_hw),
            in_specs=[
                pl.BlockSpec((1, C, hwt), lambda n, t: (n, 0, t)),   # activations
                pl.BlockSpec((1, C, 1), lambda n, t: (0, 0, 0)),     # resident weight
            ],
            out_specs=pl.BlockSpec((1, C, hwt), lambda n, t: (n, 0, t)),
        ),
        compiler_params=pltpu.CompilerParams(
            dimension_semantics=("parallel", "parallel"),
            vmem_limit_bytes=_vmem_limit(block_bytes)),
    )(x3, w3)
    return out.reshape(N, C, H, W)


# ----------------------------- reference ------------------------------------

def _reference(x_nchw, w):
    C = x_nchw.shape[1]
    w_vec = w.reshape(C).astype(jnp.float32)
    conv = jnp.einsum("nchw,c->nhw", x_nchw.astype(jnp.float32), w_vec)[:, None]
    att = jax.nn.sigmoid(conv)
    return (x_nchw * att.astype(x_nchw.dtype)).astype(x_nchw.dtype)


if __name__ == "__main__":
    key = jax.random.PRNGKey(0)
    kx1, kw1, kx2, kw2 = jax.random.split(key, 4)

    # --- Case 1: small C, HW % 128 == 0 -> leading-C (fully packed) path -----
    N, C, H, W = 2, 4, 16, 16
    x1 = jax.random.normal(kx1, (N, C, H, W), dtype=jnp.float32)
    bound = 1.0 / jnp.sqrt(jnp.array(C, dtype=jnp.float32))
    w1 = jax.random.uniform(kw1, (1, C, 1, 1), dtype=jnp.float32,
                            minval=-bound, maxval=bound)
    y1 = jax.block_until_ready(se_block(x1, w1))
    assert y1.shape == (N, C, H, W)
    assert jnp.allclose(y1, _reference(x1, w1), atol=1e-5, rtol=1e-5)

    # --- Case 2: C >= pack factor -> sublane-C fallback path -----------------
    N2, C2, H2, W2 = 2, 16, 8, 8
    x2 = jax.random.normal(kx2, (N2, C2, H2, W2), dtype=jnp.float32)
    bound2 = 1.0 / jnp.sqrt(jnp.array(C2, dtype=jnp.float32))
    w2 = jax.random.uniform(kw2, (1, C2, 1, 1), dtype=jnp.float32,
                            minval=-bound2, maxval=bound2)
    y2 = jax.block_until_ready(se_block(x2, w2))
    assert y2.shape == (N2, C2, H2, W2)
    assert jnp.allclose(y2, _reference(x2, w2), atol=1e-5, rtol=1e-5)

    print("KERNEL_OK")
</pallas_src>

<mosaic_0001>
module attributes {stable_mosaic.version = 11 : i64} {
  func.func @_sse_kernel_leading_c(%arg0: i32, %arg1: i32, %arg2: memref<1x4x2x128xf32, #tpu.memory_space<vmem>>, %arg3: memref<4xf32, #tpu.memory_space<smem>>, %arg4: memref<1x4x2x128xf32, #tpu.memory_space<vmem>>) attributes {dimension_semantics = [#tpu.dimension_semantics<parallel>, #tpu.dimension_semantics<parallel>], iteration_bounds = array<i64: 2, 1>, scalar_prefetch = 0 : i64, scratch_operands = 0 : i64, tpu.core_type = #tpu.core_type<tc>, window_params = [{transform_indices = @transform_0, window_bounds = array<i64: 1, 4, 2, 128>}, {transform_indices = @transform_1, window_bounds = array<i64: 4>}, {transform_indices = @transform_2, window_bounds = array<i64: 1, 4, 2, 128>}]} {
    %c0 = arith.constant 0 : index
    %c0_0 = arith.constant 0 : index
    %c0_1 = arith.constant 0 : index
    %c0_2 = arith.constant 0 : index
    %0 = vector.load %arg2[%c0, %c0_0, %c0_1, %c0_2] : memref<1x4x2x128xf32, #tpu.memory_space<vmem>>, vector<1x4x2x128xf32>
    %1 = vector.extract_strided_slice %0 {offsets = [0, 0, 0, 0], sizes = [1, 1, 2, 128], strides = [1, 1, 1, 1]} : vector<1x4x2x128xf32> to vector<1x1x2x128xf32>
    %2 = vector.shape_cast %1 : vector<1x1x2x128xf32> to vector<1x2x128xf32>
    %c0_3 = arith.constant 0 : index
    %3 = memref.load %arg3[%c0_3] : memref<4xf32, #tpu.memory_space<smem>>
    %4 = vector.broadcast %3 : f32 to vector<1x2x128xf32>
    %5 = arith.mulf %2, %4 : vector<1x2x128xf32>
    %6 = vector.extract_strided_slice %0 {offsets = [0, 1, 0, 0], sizes = [1, 1, 2, 128], strides = [1, 1, 1, 1]} : vector<1x4x2x128xf32> to vector<1x1x2x128xf32>
    %7 = vector.shape_cast %6 : vector<1x1x2x128xf32> to vector<1x2x128xf32>
    %c1 = arith.constant 1 : index
    %8 = memref.load %arg3[%c1] : memref<4xf32, #tpu.memory_space<smem>>
    %9 = vector.broadcast %8 : f32 to vector<1x2x128xf32>
    %10 = arith.mulf %7, %9 : vector<1x2x128xf32>
    %11 = arith.addf %5, %10 : vector<1x2x128xf32>
    %12 = vector.extract_strided_slice %0 {offsets = [0, 2, 0, 0], sizes = [1, 1, 2, 128], strides = [1, 1, 1, 1]} : vector<1x4x2x128xf32> to vector<1x1x2x128xf32>
    %13 = vector.shape_cast %12 : vector<1x1x2x128xf32> to vector<1x2x128xf32>
    %c2 = arith.constant 2 : index
    %14 = memref.load %arg3[%c2] : memref<4xf32, #tpu.memory_space<smem>>
    %15 = vector.broadcast %14 : f32 to vector<1x2x128xf32>
    %16 = arith.mulf %13, %15 : vector<1x2x128xf32>
    %17 = arith.addf %11, %16 : vector<1x2x128xf32>
    %18 = vector.extract_strided_slice %0 {offsets = [0, 3, 0, 0], sizes = [1, 1, 2, 128], strides = [1, 1, 1, 1]} : vector<1x4x2x128xf32> to vector<1x1x2x128xf32>
    %19 = vector.shape_cast %18 : vector<1x1x2x128xf32> to vector<1x2x128xf32>
    %c3 = arith.constant 3 : index
    %20 = memref.load %arg3[%c3] : memref<4xf32, #tpu.memory_space<smem>>
    %21 = vector.broadcast %20 : f32 to vector<1x2x128xf32>
    %22 = arith.mulf %19, %21 : vector<1x2x128xf32>
    %23 = arith.addf %17, %22 : vector<1x2x128xf32>
    %24 = arith.negf %23 : vector<1x2x128xf32>
    %25 = math.exp %24 : vector<1x2x128xf32>
    %cst = arith.constant 1.000000e+00 : f32
    %26 = vector.broadcast %cst : f32 to vector<1x2x128xf32>
    %27 = arith.addf %26, %25 : vector<1x2x128xf32>
    %28 = arith.divf %26, %27 : vector<1x2x128xf32>
    %29 = vector.shape_cast %28 : vector<1x2x128xf32> to vector<1x1x2x128xf32>
    %30 = vector.broadcast %29 : vector<1x1x2x128xf32> to vector<1x4x2x128xf32>
    %31 = arith.mulf %0, %30 : vector<1x4x2x128xf32>
    %c0_4 = arith.constant 0 : index
    %c0_5 = arith.constant 0 : index
    %c0_6 = arith.constant 0 : index
    %c0_7 = arith.constant 0 : index
    %32 = vector.load %arg4[%c0_4, %c0_5, %c0_6, %c0_7] : memref<1x4x2x128xf32, #tpu.memory_space<vmem>>, vector<1x4x2x128xf32>
    tpu.vector_store %arg4[%c0_4, %c0_5, %c0_6, %c0_7], %31 {strides = array<i32>} : memref<1x4x2x128xf32, #tpu.memory_space<vmem>>, vector<1x4x2x128xf32>,
    return
  }
  func.func @transform_0(%arg0: i32, %arg1: i32) -> (i32, i32, i32, i32) {
    %c0_i32 = arith.constant 0 : i32
    %c0_i32_0 = arith.constant 0 : i32
    %c0_i32_1 = arith.constant 0 : i32
    return %arg0, %c0_i32, %arg1, %c0_i32_0 : i32, i32, i32, i32
  }
  func.func @transform_1(%arg0: i32, %arg1: i32) -> i32 {
    %c0_i32 = arith.constant 0 : i32
    %c0_i32_0 = arith.constant 0 : i32
    return %c0_i32 : i32
  }
  func.func @transform_2(%arg0: i32, %arg1: i32) -> (i32, i32, i32, i32) {
    %c0_i32 = arith.constant 0 : i32
    %c0_i32_0 = arith.constant 0 : i32
    %c0_i32_1 = arith.constant 0 : i32
    return %arg0, %c0_i32, %arg1, %c0_i32_0 : i32, i32, i32, i32
  }
}

</mosaic_0001>

<bundles_post_ra>
// kernel: tpu_custom_call.1
= control target key start
LH: loop header
LB: loop body
LE: loop exit
PB: predicated region body
PF: predicated region fallthrough
CT: control target
= control target key end

     0   :  { %7 = vsyncpa [#allocation3], 0  ;;  %s767_s0 = inlined_call_operand.hbm [shape: f32[2,4,2,128], index: 0, kind: input, shape index: {}]   ;;  %s768_s1 = inlined_call_operand.hbm [shape: f32[4], index: 1, kind: input, shape index: {}]   ;;  %s769_s2 = inlined_call_operand.hbm [shape: f32[2,4,2,128], index: 2, kind: output, shape index: {}]  }
   0x1   :  { %9 = vsyncpa [#allocation3 + $0x1], 0 }
   0x2   :  { %10 = vsyncpa [#allocation5], 0 }
   0x3   :  { %11 = vsyncpa [#allocation4], 0 }
   0x4   :  { %13 = vsyncpa [#allocation4 + $0x1], 0  ;;  %s612_s9 = smov 0   ;;  %s614_s10 = smov 0  }
   0x5   :  { %s616_s11 = smov 0   ;;  %s618_s12 = smov 0  }
   0x6   :  { %s620_s13 = smov 0   ;;  %s622_s14 = smov 0  }
   0x7 LB: > { %s355_s15 = sadd.s32 4294967295, %s590_s14   ;;  %s356_s16 = sadd.s32 4294967294, %s590_s14   ;;  %s590_s14 = sphi %s622_s14, %s19_s14   ;;  %s586_s13 = sphi %s620_s13, %s781_s13   ;;  %s582_s12 = sphi %s618_s12, %s780_s12   ;;  %s578_s11 = sphi %s616_s11, %s779_s11   ;;  %s574_s10 = sphi %s614_s10, %s778_s10   ;;  %s570_s9 = sphi %s612_s9, %s777_s9  }
   0x8   : > { %s40_s17 = sadd.s32 1, %s578_s11  ;;  %p47_p0 = scmp.ne.s32.totalorder %s578_s11, %s574_s10 }
   0x9   : > { %p48_p1 = scmp.eq.s32.totalorder %s590_s14, 0  ;;  %p53_p2 = scmp.ne.s32.totalorder %s574_s10, %s570_s9 }
   0xa   : > { %p650_p3 = scmp.eq.s32.totalorder %s355_s15, 0  ;;  %p100_p4 = scmp.eq.s32.totalorder %s355_s15, 1 }
   0xb   : > { %p654_p5 = por %p48_p1, %p47_p0  ;;  %p106_p6 = scmp.eq.s32.totalorder %s356_s16, 1 }
   0xc   : > { %p660_p7 = por %p650_p3, %p53_p2  ;;  %p664_p8 = por %p100_p4, %p47_p0 }
   0xd   : > { %p668_p9 = por %p106_p6, %p53_p2  ;;  %p357_p10 = scmp.ge.s32.totalorder %s590_s14, 1 }
   0xe   : > { %p113_p11 = scmp.lt.s32.totalorder %s590_s14, 3  ;;  %s125_s25 = sshll.u32 %s768_s1, 4  ;;  %s126_s25 = int_to_ptr.hbm [resolvable:$true] %s125_s25 }
   0xf   : > { %p359_p13 = scmp.ge.s32.totalorder %s590_s14, 2  ;;  %p399_p0 = scmp.lt.s32.totalorder %s590_s14, 2 }
  0x10   : > { %p677_p12 = pnand %p357_p10, %p113_p11  ;;  %s31_s28 = sadd.s32 1, %s586_s13 }
  0x11   : > { %p687_p2 = pnand %p399_p0, %p654_p5  ;;  %p33_p6 = scmp.ge.s32.totalorder %s31_s28, 2 }
  0x12   : > { %p386_p1 = pneg %p677_p12  ;;  %s136_s29 = sand.u32 1, %s578_s11  }
  0x13   : > { %s592_s30 = smov [#allocation6]   ;;  %s783_s28 = smov (%p33_p6, %s31_s28), 0 }
  0x14   : > { %p387_p4 = pnand %p386_p1, %p650_p3  ;;  %s360_s3 = sshll.u32 %s136_s29, 3 }
  0x15   : > { %s35_s4 = ssub.s32 %s586_s13, %s783_s28  ;;  %s376_s5 = sshll.u32 %s586_s13, 3 }
  0x16   : > { %389 = dma.hbm_to_smem (!%p387_p4), %s126_s25, 16, %s592_s30, [#allocation5]  }
  0x17   : > { %p38_p10 = scmp.eq.s32.totalorder %s35_s4, 0  ;;  %s146_s8 = scalar_lea.hbm %s767_s0, %s376_s5 }
  0x18   : > { %s140_s15 = scalar_lea.vmem [#allocation2], %s360_s3  ;;  %s147_s23 = sshll.u32 %s146_s8, 4  ;;  %s148_s23 = int_to_ptr.hbm [resolvable:$true] %s147_s23 }
  0x19   : > { %s149_s16 = sshll.u32 %s140_s15, 4  ;;  %s137_s24 = scalar_lea.sflag [#allocation3], %s136_s29  ;;  %s150_s16 = int_to_ptr.vmem [resolvable:$true] %s149_s16 }
  0x1a   : > { %s706_s19 = scalar_select %p38_p10, %s578_s11, %s40_s17  }
  0x1b   : > { %s593_s25 = smov 32   ;;  %s594_s30 = smov 2  }
  0x1c   : > { %393 = dma.hbm_to_vmem [thread:$0]  (!%p687_p2), %s148_s23, 128, %s150_s16, %s137_s24, %s593_s25, %s593_s25, %s594_s30  }
  0x1d   : > { %161 = sbr.rel (%p677_p12) target bundleno = 92 (0x5c), region = 28  ;;  %s713_s4 = sand.u32 (!%p677_p12), 1, %s574_s10  }
  0x1e   : > { %s364_s17 = sshll.u32 (!%p677_p12), %s713_s4, 3  ;;  %s164_s3 = scalar_lea.sflag (!%p677_p12), [#allocation3], %s713_s4 }
  0x1f   : > { %s167_s5 = scalar_lea.vmem (!%p677_p12), [#allocation2], %s364_s17 }
  0x22   : > { %557 = dma.done.wait (%p660_p7), %s164_s3, 128  }
  0x23   : > { %559 = vsyncadd (%p660_p7), %s164_s3, 4294967168 }
  0x24   : > { %561 = dma.done.wait (%p650_p3), [#allocation5], 16  }
  0x25   : > { %563 = vsyncadd (%p650_p3), [#allocation5], 4294967280 }
  0x26   : > { %178 = sfence }
  0x27   : > { %s199_s26 = sld [smem:[#allocation6]]  ;;  %v195_v0 = vld [vmem:[%s167_s5] sm:$0x3]  ;;  %v196_v1 = vld [vmem:[%s167_s5 + $0x2] sm:$0x3]  ;;  %s377_s18 = sshll.u32 %s582_s12, 3 }
  0x28   : > { %s367_s27 = sld [smem:[#allocation6 + $0x1]]  ;;  %v197_v2 = vld [vmem:[%s167_s5 + $0x4] sm:$0x3]  ;;  %v198_v4 = vld [vmem:[%s167_s5 + $0x6] sm:$0x3]  ;;  %s254_s8 = scalar_lea.hbm %s769_s2, %s377_s18 }
  0x29   : > { %s368_s29 = sld [smem:[#allocation6 + $0x2]]  ;;  %s194_s15 = scalar_lea.vmem [#allocation7], %s364_s17 }
  0x2a   : > { %s369_s6 = sld [smem:[#allocation6 + $0x3]]  ;;  %s255_s16 = sshll.u32 %s194_s15, 4  ;;  %s256_s16 = int_to_ptr.vmem [resolvable:$true] %s255_s16 }
  0x2b   : > { %s257_s23 = sshll.u32 %s254_s8, 4  ;;  %s242_s12 = scalar_lea.sflag [#allocation4], %s713_s4  ;;  %s258_s23 = int_to_ptr.hbm [resolvable:$true] %s257_s23 }
  0x2c   : > { %s518_s24 = sshra.s32 %s258_s23, 4  ;;  %s524_s3 = scalar_lea.hbm %s769_s2, 16  ;;  %s519_s24 = int_to_ptr.hbm [resolvable:$true] %s518_s24 }
  0x2d   : > { %v200_v3 = vstv %s199_s26  ;;  %s520_s25 = scalar_lea.hbm %s519_s24, 8  ;;  %p525_p11 = scmp.lt.s32.totalorder %s519_s24, %s769_s2 }
  0x2e   : > { %v201_v5 = vmul.f32 %v200_v3, %v195_v0  ;;  %v203_v6 = vstv %s367_s27  ;;  %p521_p3 = scmp.ne.s32.totalorder %s519_s24, %s520_s25  ;;  %p526_p12 = scmp.lt.s32.totalorder %s524_s3, %s520_s25 }
  0x2f   : > { %v204_v7 = vmul.f32 %v203_v6, %v196_v1  ;;  %v207_v8 = vstv %s368_s29 }
  0x30   : > { %v208_v9 = vmul.f32 %v207_v8, %v197_v2  ;;  %v211_v10 = vstv %s369_s6  ;;  %p522_p5 = pnand %p521_p3, %p664_p8  ;;  %p527_p0 = por %p526_p12, %p525_p11 }
  0x31   : > { %v205_v11 = vadd.f32 %v204_v7, %v201_v5  ;;  %v212_v12 = vmul.f32 %v211_v10, %v198_v4 }
  0x32   : > { %p523_p7 = pneg %p522_p5 }
  0x33   : > { %v209_v13 = vadd.f32 %v208_v9, %v205_v11 }
  0x34   : > { %p528_p1 = pnand %p527_p0, %p523_p7 }
  0x35   : > { %v213_v14 = vadd.f32 %v212_v12, %v209_v13 }
  0x37   : > { %v370_v15 = vmul.f32 -1.442695, %v213_v14 }
  0x39   : > { %455 = vpow2.f32 %v370_v15 }
  0x3f   : > { %v456_v16 = vpop.eup %455 }
  0x40   : > { %v217_v17 = vadd.f32 1.0, %v456_v16 }
  0x42   : > { %457 = vrcp.f32 %v217_v17  ;;  %v229_v20 = vand.u32 2147483648, %v217_v17  ;;  %vm223_vm0 = vweird.f32 %v217_v17  ;;  %v227_v22 = vand.u32 2147483647, %v217_v17 }
  0x44   : > { %v230_v24 = vor.u32 1.1754944e-38, %v229_v20  ;;  %vm228_vm3 = vcmp.eq.f32.partialorder %v227_v22, 8.507059e+37 }
  0x48   : > { %v458_v18 = vpop.eup %457 }
  0x49   : > { %v219_v19 = vmul.f32 %v458_v18, %v217_v17  ;;  %vm224_vm1 = vweird.f32 %v458_v18 }
  0x4a   : > { %vm225_vm2 = vmor %vm223_vm0, %vm224_vm1 }
  0x4b   : > { %v220_v21 = vsub.f32 1.0, %v219_v19 }
  0x4d   : > { %v221_v23 = vmul.f32 %v458_v18, %v220_v21 }
  0x4f   : > { %v222_v25 = vadd.f32 %v458_v18, %v221_v23 }
  0x51   : > { %v226_v26 = vsel %vm225_vm2, %v458_v18, %v222_v25 }
  0x52   : > { %v231_v27 = vsel %vm228_vm3, %v230_v24, %v226_v26 }
  0x53   : > { %v233_v28 = vmul.f32 %v231_v27, %v195_v0  ;;  %v234_v29 = vmul.f32 %v231_v27, %v196_v1  ;;  %v235_v30 = vmul.f32 %v231_v27, %v197_v2  ;;  %v236_v31 = vmul.f32 %v231_v27, %v198_v4 }
  0x55   : > { %237 = vst [vmem:[%s194_s15] sm:$0x3] %v233_v28 }
  0x56   : > { %238 = vst [vmem:[%s194_s15 + $0x2] sm:$0x3] %v234_v29 }
  0x57   : > { %239 = vst [vmem:[%s194_s15 + $0x4] sm:$0x3] %v235_v30 }
  0x58   : > { %240 = vst [vmem:[%s194_s15 + $0x6] sm:$0x3] %v236_v31 }
  0x59   : > { %531 = shalt.err (!%p528_p1)
}
  0x5a   : > { %s595_s4 = smov 32   ;;  %s596_s27 = smov 2  }
  0x5b   : > { %384 = dma.vmem_to_hbm [thread:$0]  (%p664_p8), %s256_s16, 128, %s258_s23, %s242_s12, %s595_s4, %s595_s4, %s596_s27  }
  0x5c PF: > { %s272_s29 = sand.u32 1, %s570_s9   ;;  %p395_p2 = pnand %p359_p13, %p668_p9 }
  0x5d   : > { %s273_s6 = scalar_lea.sflag [#allocation4], %s272_s29 }
  0x5e   : > { %p396_p4 = pneg %p395_p2 }
  0x60   : > { %565 = dma.done.wait (%p396_p4), %s273_s6, 128  }
  0x61   : > { %567 = vsyncadd (%p396_p4), %s273_s6, 4294967168  ;;  %s19_s14 = sadd.s32 1, %s590_s14   ;;  %s777_s9 = smov %s574_s10 }
  0x62   : > { %p16_p6 = scmp.ge.s32.totalorder %s19_s14, 4   ;;  %s778_s10 = smov %s578_s11 }
  0x63   : > { %s779_s11 = smov %s706_s19  ;;  %s780_s12 = smov %s586_s13 }
  0x64   : > { %s781_s13 = smov %s783_s28  ;;  %18 = sbr.rel (!%p16_p6) target bundleno = 7 (0x7), region = 78 }
  0x69   :  { %279 = vsyncpa [#allocation3], 1 }
  0x6a   :  { %281 = vsyncpa [#allocation3 + $0x1], 1 }
  0x6b   :  { %282 = vsyncpa [#allocation4], 1 }
  0x6c   :  { %284 = vsyncpa [#allocation4 + $0x1], 1 }
  0x6d   :  { %285 = vsyncpa [#allocation5], 1 }
  0x6e   :  { %287 = vsyncpa [#allocation5 + $0x1], 1 }

</bundles_post_ra>
